<compile_context>
chip_gen: v5e
topology: v5e:2x2
jax: 0.10.0
libtpu: 0.0.40
codegen_flags: <defaults>
</compile_context>

<pallas_src>
import math
import warnings

import jax
import jax.numpy as jnp
from jax.experimental import pallas as pl
from jax.experimental.pallas import tpu as pltpu

LANE = 128
TARGET_BLOCK_BYTES = 4 * 1024 * 1024   # ~4 MiB blocks -> ~16 MiB pipelined footprint
MIN_SPLIT_BYTES = 1 * 1024 * 1024      # split into >=2 blocks above this (v7x megacore)
_MIB = 1024 * 1024


def _copy_kernel(x_ref, o_ref):
    o_ref[...] = x_ref[...]


def _round_up(a, b):
    return -(-a // b) * b


def _resolve_shape(shape, numel):
    """PyTorch-style view-shape resolution (supports a single -1)."""
    shape = tuple(int(s) for s in shape)
    if shape.count(-1) > 1:
        raise ValueError("only one dimension can be inferred")
    known = math.prod(s for s in shape if s != -1)
    if -1 in shape:
        if known == 0 or numel % known != 0:
            raise ValueError(f"shape {shape} is invalid for input of size {numel}")
        shape = tuple(numel // known if s == -1 else s for s in shape)
    if math.prod(shape) != numel:
        raise ValueError(f"shape {shape} is invalid for input of size {numel}")
    return shape


def _identity_copy(x2, block_shape, grid, vmem_limit):
    index_map = (lambda i: (i,)) if len(block_shape) == 1 else (lambda i: (i, 0))
    return pl.pallas_call(
        _copy_kernel,
        out_shape=jax.ShapeDtypeStruct(x2.shape, x2.dtype),
        grid=grid,
        in_specs=[pl.BlockSpec(block_shape, index_map)],
        out_specs=pl.BlockSpec(block_shape, index_map),
        input_output_aliases={0: 0},     # reuse input HBM buffer for the output
        compiler_params=pltpu.CompilerParams(
            dimension_semantics=("parallel",),
            vmem_limit_bytes=vmem_limit),
    )(x2)


def _materialized_view(x, out_shape):
    n = int(x.size)
    itemsize = jnp.dtype(x.dtype).itemsize
    # Sublane alignment of the tiled second-to-last dim: 8 (32-bit), 16 (16-bit),
    # 32 (8-bit).  TODO(synk): 4-bit dtypes would need 64-row alignment.
    packing = max(1, 4 // max(1, itemsize))
    align = 8 * packing

    if n % LANE == 0:
        # Lane-dense 2-D slab; the reshape is a free row-major bitcast.
        C = LANE
        for cand in (4096, 2048, 1024, 512, 256):
            if n % cand == 0:
                C = cand
                break
        rows = n // C
        x2 = jnp.reshape(x, (rows, C))
        row_bytes = C * itemsize
        tm_target = _round_up(max(align, TARGET_BLOCK_BYTES // row_bytes), align)
        if rows > tm_target:
            tm = tm_target                              # multi-MiB tiles, masked tail
        elif rows * row_bytes >= MIN_SPLIT_BYTES and rows >= 2 * align:
            tm = _round_up(pl.cdiv(rows, 2), align)     # >=2 blocks for v7x's 2 TCs
        else:
            tm = rows                                   # full-extent block (exempt)
        block = (tm, C)
        block_bytes = tm * row_bytes
        grid = (pl.cdiv(rows, tm),)
    else:
        # Ragged element count: 1-D copy, Pallas masks the partial last block,
        # so there is no host-side pad or slice pass over HBM.
        x2 = jnp.reshape(x, (n,))
        unit = 8 * LANE * packing
        blk = _round_up(max(unit, TARGET_BLOCK_BYTES // itemsize), unit)
        if n > blk:
            pass
        elif n * itemsize >= MIN_SPLIT_BYTES and n >= 2 * unit:
            blk = _round_up(pl.cdiv(n, 2), unit)
        else:
            blk = n                                     # full-extent block (exempt)
        block = (blk,)
        block_bytes = blk * itemsize
        grid = (pl.cdiv(n, blk),)

    # 2 input + 2 output buffers plus margin; capped for v7x's 64 MiB VMEM.
    vmem_limit = int(min(48 * _MIB, max(32 * _MIB, 6 * block_bytes)))
    y = _identity_copy(x2, block, grid, vmem_limit)
    return jnp.reshape(y, out_shape)


def pallas_view(x, shape, *, materialize=True):
    out_shape = _resolve_shape(shape, x.size)
    if not materialize or x.size == 0:
        # A view is metadata-only; a row-major reshape is free in XLA.
        return jnp.reshape(x, out_shape)
    return _materialized_view(x, out_shape)


class View:
    """Mirror of the PyTorch module: stores the target shape, forwards via Pallas."""

    def __init__(self, shape, materialize=True):
        self.shape = shape
        self.materialize = materialize

    def __call__(self, x):
        return pallas_view(x, self.shape, materialize=self.materialize)


if __name__ == "__main__":
    # Benign notice if XLA decides not to reuse the donated buffer.
    warnings.filterwarnings("ignore", message="Some donated buffers were not usable")

    key = jax.random.PRNGKey(0)
    x = jax.random.normal(key, (2, 4, 16, 16), jnp.float32)

    # Reference computed before donating x.
    ref = jnp.reshape(x, (2, 4 * 16 * 16))

    view = View((2, -1))                                  # View(shape) as in the module
    fwd = jax.jit(view, donate_argnums=(0,))              # lets the alias be in-place
    out = jax.block_until_ready(fwd(x))

    assert out.shape == ref.shape, out.shape
    assert bool(jnp.array_equal(out, ref))
    assert bool(jnp.all(jnp.isfinite(out)))
    print("KERNEL_OK")
</pallas_src>

<mosaic_0001>
module attributes {stable_mosaic.version = 11 : i64} {
  func.func @_copy_kernel(%arg0: i32, %arg1: memref<1x2048xf32, #tpu.memory_space<vmem>>, %arg2: memref<1x2048xf32, #tpu.memory_space<vmem>>) attributes {dimension_semantics = [#tpu.dimension_semantics<parallel>], iteration_bounds = array<i64: 1>, scalar_prefetch = 0 : i64, scratch_operands = 0 : i64, tpu.core_type = #tpu.core_type<tc>, window_params = [{transform_indices = @transform_0, window_bounds = array<i64: 1, 2048>}, {transform_indices = @transform_1, window_bounds = array<i64: 1, 2048>}]} {
    %c0 = arith.constant 0 : index
    %c0_0 = arith.constant 0 : index
    %0 = vector.load %arg1[%c0, %c0_0] : memref<1x2048xf32, #tpu.memory_space<vmem>>, vector<1x2048xf32>
    %c0_1 = arith.constant 0 : index
    %c0_2 = arith.constant 0 : index
    %1 = vector.load %arg2[%c0_1, %c0_2] : memref<1x2048xf32, #tpu.memory_space<vmem>>, vector<1x2048xf32>
    tpu.vector_store %arg2[%c0_1, %c0_2], %0 {strides = array<i32>} : memref<1x2048xf32, #tpu.memory_space<vmem>>, vector<1x2048xf32>,
    return
  }
  func.func @transform_0(%arg0: i32) -> (i32, i32) {
    %c0_i32 = arith.constant 0 : i32
    %c0_i32_0 = arith.constant 0 : i32
    return %arg0, %c0_i32 : i32, i32
  }
  func.func @transform_1(%arg0: i32) -> (i32, i32) {
    %c0_i32 = arith.constant 0 : i32
    %c0_i32_0 = arith.constant 0 : i32
    return %arg0, %c0_i32 : i32, i32
  }
}

</mosaic_0001>

<bundles_post_ra>
// kernel: _unnamed_function_.1
= control target key start
LH: loop header
LB: loop body
LE: loop exit
PB: predicated region body
PF: predicated region fallthrough
CT: control target
= control target key end

     0   :  { %s38_s0 = inlined_call_operand.vmem [shape: f32[1,2048], index: 0, kind: input, shape index: {}, may-alias: {0,1}]   ;;  %s39_s1 = inlined_call_operand.vmem [shape: f32[1,2048], index: 1, kind: output, shape index: {}, may-alias: {0,1}]  }
   0x1   :  { %v8_v0 = vld [vmem:[%s38_s0] sm:$0xff]  ;;  %v9_v1 = vld [vmem:[%s38_s0 + $0x8] sm:$0xff] }
   0x2   :  { %10 = vst [vmem:[%s39_s1] sm:$0xff] %v8_v0 }
   0x3   :  { %11 = vst [vmem:[%s39_s1 + $0x8] sm:$0xff] %v9_v1 }

</bundles_post_ra>
